<compile_context>
chip_gen: v7x
topology: tpu7x:2x2x1
jax: 0.10.0
libtpu: 0.0.40
codegen_flags: <defaults>
</compile_context>

<pallas_src>
import functools

import jax
import jax.numpy as jnp
from jax.experimental import pallas as pl
from jax.experimental.pallas import tpu as pltpu


def _round_up(v: int, m: int) -> int:
    return ((v + m - 1) // m) * m


# Minimum second-minor (sublane) tile per compute-dtype byte width.
_MIN_SUBLANE = {4: 8, 2: 16, 1: 32}


def _fc_block_kernel(*refs, activation: str, has_bias: bool, acc_in_out: bool):
    # refs layout: x, w, [bias], out, [acc scratch]
    #   x_ref: (tm, tk)       input tile
    #   w_ref: (tk, tn)       pre-transposed weight tile -> plain (M,K)x(K,N)
    #   b_ref: (1,  tn)       bias tile (only when has_bias)
    #   o_ref: (tm, tn)       output tile (resident across k; accumulator when f32)
    #   acc_ref: (tm, tn) f32 scratch accumulator (only when not acc_in_out)
    if has_bias:
        x_ref, w_ref, b_ref, o_ref, *rest = refs
    else:
        x_ref, w_ref, o_ref, *rest = refs
        b_ref = None
    acc_ref = o_ref if acc_in_out else rest[0]

    k = pl.program_id(2)

    @pl.when(k == 0)
    def _():
        acc_ref[...] = jnp.zeros_like(acc_ref)

    acc_ref[...] += jnp.dot(x_ref[...], w_ref[...],
                            preferred_element_type=jnp.float32)

    @pl.when(k == pl.num_programs(2) - 1)
    def _():
        acc = acc_ref[...].astype(jnp.float32)
        if has_bias:
            acc = acc + b_ref[...].astype(jnp.float32)
        if activation == "relu":
            acc = jnp.maximum(acc, 0.0)
        elif activation == "tanh":
            acc = jnp.tanh(acc)
        elif activation == "sigmoid":
            acc = jax.nn.sigmoid(acc)
        # "none": linear only
        o_ref[...] = acc.astype(o_ref.dtype)


def prepare_fc_params(weight, bias=None, *, mxu_input_dtype=None):
    """One-time parameter prep (call once per layer and cache the result).

    weight: (out_dim, inp_dim) -- PyTorch nn.Linear layout.
    bias:   (out_dim,) or None.
    mxu_input_dtype: e.g. jnp.bfloat16 to feed the MXU narrow operands
                     (f32 accumulation stays inside the kernel).

    Pads N to a multiple of 256, K to the reduction tile, transposes the
    weight to (K_pad, N_pad) and casts it -- all once, so the per-call forward
    only pads/casts x.
    """
    N, K = weight.shape
    compute_dtype = (jnp.dtype(mxu_input_dtype) if mxu_input_dtype is not None
                     else jnp.dtype(weight.dtype))
    itemsize = compute_dtype.itemsize

    # Output width: full 256-wide MXU tiles on v6e/v7x, lane-dense stores.
    N_pad = _round_up(N, 256)
    tn = 512 if (N_pad % 512 == 0 and N_pad >= 512) else 256

    # Reduction tile: larger for narrower dtypes (same byte footprint).
    tk_target = 512 if itemsize >= 4 else 1024
    K_pad = _round_up(K, 128)
    if K_pad <= tk_target:
        tk = K_pad
    else:
        tk = tk_target
        K_pad = _round_up(K_pad, tk)

    w_t = jnp.pad(weight, ((0, N_pad - N), (0, K_pad - K))).T   # (K_pad, N_pad)
    w_t = w_t.astype(compute_dtype)

    b_row = None
    if bias is not None:
        b_row = jnp.pad(bias.astype(jnp.float32), (0, N_pad - N)).reshape(1, N_pad)

    return dict(w_t=w_t, b_row=b_row, N=N, K=K, N_pad=N_pad, K_pad=K_pad,
                tn=tn, tk=tk, compute_dtype=compute_dtype)


def fc_block_forward(x, weight=None, bias=None, *, params=None,
                     activation="relu", include_activation=True,
                     dropout_prob=0.0, training=False, tm=None,
                     mxu_input_dtype=None, return_padded=False):
    """Forward of FCBlock: y = act(x @ weight.T + bias) [+ dropout in training].

    Either pass (weight, bias) in PyTorch layout, or a cached `params` from
    prepare_fc_params (preferred: avoids per-call HBM pad/cast/transpose of
    the weight).
    """
    if dropout_prob > 0.0 and training:
        # TODO(synk): training-mode dropout (in-kernel pltpu PRNG mask) not implemented.
        raise NotImplementedError("training-mode dropout not implemented in-kernel")
    # Eval-mode dropout (or p == 0) is identity.

    if params is None:
        # NOTE: for best perf call prepare_fc_params once and reuse `params`.
        params = prepare_fc_params(weight, bias, mxu_input_dtype=mxu_input_dtype)

    act = activation.lower() if include_activation else "none"
    if act not in ("relu", "tanh", "sigmoid", "none"):
        raise ValueError(f"unsupported activation: {activation}")

    w_t, b_row = params["w_t"], params["b_row"]
    N, K = params["N"], params["K"]
    N_pad, K_pad = params["N_pad"], params["K_pad"]
    tn, tk = params["tn"], params["tk"]
    compute_dtype = params["compute_dtype"]

    B, Kx = x.shape
    assert Kx == K, (Kx, K)
    out_dtype = jnp.dtype(x.dtype)

    # ---- batch tile (respect packed-dtype minimum sublane tile) ----
    min_m = _MIN_SUBLANE.get(compute_dtype.itemsize, 8)
    if tm is None:
        tm = 512 if B >= 512 else _round_up(B, min_m)
    else:
        tm = _round_up(tm, min_m)
    B_pad = _round_up(B, tm)

    # v7x has 2 TensorCores: try to give the parallel grid >= 2 steps.
    tn_eff = tn
    if (B_pad // tm) * (N_pad // tn_eff) < 2 and N_pad // 256 >= 2:
        tn_eff = 256

    # ---- per-call: pad/cast only x (zeros contribute nothing to the matmul) ----
    x_p = x
    if (B_pad, K_pad) != (B, K):
        x_p = jnp.pad(x_p, ((0, B_pad - B), (0, K_pad - K)))
    if x_p.dtype != compute_dtype:
        x_p = x_p.astype(compute_dtype)

    has_bias = b_row is not None
    acc_in_out = (out_dtype == jnp.dtype(jnp.float32))

    grid = (B_pad // tm, N_pad // tn_eff, K_pad // tk)

    in_specs = [
        pl.BlockSpec((tm, tk), lambda i, j, k: (i, k)),        # x tile
        pl.BlockSpec((tk, tn_eff), lambda i, j, k: (k, j)),    # weight tile (K,N)
    ]
    inputs = [x_p, w_t]
    if has_bias:
        in_specs.append(pl.BlockSpec((1, tn_eff), lambda i, j, k: (0, j)))
        inputs.append(b_row)

    scratch_shapes = [] if acc_in_out else [pltpu.VMEM((tm, tn_eff), jnp.float32)]

    kernel = functools.partial(_fc_block_kernel, activation=act,
                               has_bias=has_bias, acc_in_out=acc_in_out)

    flops = 2 * B_pad * N_pad * K_pad
    transcendentals = B_pad * N_pad if act in ("tanh", "sigmoid") else 0
    bytes_accessed = (x_p.size * x_p.dtype.itemsize
                      + w_t.size * w_t.dtype.itemsize
                      + (b_row.size * b_row.dtype.itemsize if has_bias else 0)
                      + B_pad * N_pad * out_dtype.itemsize)

    out_padded = pl.pallas_call(
        kernel,
        out_shape=jax.ShapeDtypeStruct((B_pad, N_pad), out_dtype),
        grid_spec=pltpu.PrefetchScalarGridSpec(
            num_scalar_prefetch=0,
            grid=grid,
            in_specs=in_specs,
            out_specs=pl.BlockSpec((tm, tn_eff), lambda i, j, k: (i, j)),
            scratch_shapes=scratch_shapes,
        ),
        compiler_params=pltpu.CompilerParams(
            dimension_semantics=("parallel", "parallel", "arbitrary"),
            vmem_limit_bytes=32 * 1024 * 1024),
        cost_estimate=pl.CostEstimate(flops=flops,
                                      transcendentals=transcendentals,
                                      bytes_accessed=bytes_accessed),
    )(*inputs)

    if return_padded:
        return out_padded
    if (B_pad, N_pad) != (B, N):
        out_padded = out_padded[:B, :N]
    return out_padded


def _ref(x, w, b=None, act="relu"):
    y = x @ w.T
    if b is not None:
        y = y + b
    if act == "relu":
        y = jnp.maximum(y, 0.0)
    elif act == "tanh":
        y = jnp.tanh(y)
    elif act == "sigmoid":
        y = jax.nn.sigmoid(y)
    return y


if __name__ == "__main__":
    key = jax.random.PRNGKey(0)

    # --- test 1: FCBlock(inp_dim=32, out_dim=32), relu, bias, prepared params ---
    B, INP_DIM, OUT_DIM = 8, 32, 32
    kx, kw, kb, key = jax.random.split(key, 4)
    x = jax.random.normal(kx, (B, INP_DIM), dtype=jnp.float32)
    bound = 1.0 / jnp.sqrt(jnp.float32(INP_DIM))
    weight = jax.random.uniform(kw, (OUT_DIM, INP_DIM), dtype=jnp.float32,
                                minval=-bound, maxval=bound)
    bias = jax.random.uniform(kb, (OUT_DIM,), dtype=jnp.float32,
                              minval=-bound, maxval=bound)

    prm = prepare_fc_params(weight, bias)            # one-time prep (cacheable)
    out = jax.block_until_ready(
        fc_block_forward(x, params=prm, activation="relu",
                         include_activation=True, dropout_prob=0.0))
    ref = _ref(x, weight, bias, "relu")
    assert out.shape == (B, OUT_DIM)
    assert jnp.allclose(out, ref, atol=1e-5, rtol=1e-5)

    # --- test 2: non-tile-aligned shapes (remainder handling) + tanh ---
    B2, INP2, OUT2 = 50, 200, 96
    kx2, kw2, kb2, key = jax.random.split(key, 4)
    x2 = jax.random.normal(kx2, (B2, INP2), dtype=jnp.float32)
    w2 = jax.random.normal(kw2, (OUT2, INP2), dtype=jnp.float32) * 0.05
    b2 = jax.random.normal(kb2, (OUT2,), dtype=jnp.float32) * 0.05
    out2 = jax.block_until_ready(
        fc_block_forward(x2, w2, b2, activation="tanh", include_activation=True))
    ref2 = _ref(x2, w2, b2, "tanh")
    assert out2.shape == (B2, OUT2)
    assert jnp.allclose(out2, ref2, atol=1e-4, rtol=1e-4)

    # --- test 3: bf16 MXU inputs, f32 accumulation, prepared params ---
    prm_bf16 = prepare_fc_params(w2, b2, mxu_input_dtype=jnp.bfloat16)
    out3 = jax.block_until_ready(
        fc_block_forward(x2, params=prm_bf16, activation="relu"))
    ref3 = _ref(x2, w2, b2, "relu")
    assert jnp.allclose(out3, ref3, atol=5e-2, rtol=5e-2)

    # --- test 4: bias=False + no activation (bias-less kernel variant) ---
    out4 = jax.block_until_ready(
        fc_block_forward(x, weight, None, activation="relu",
                         include_activation=False))
    ref4 = _ref(x, weight, None, "none")
    assert jnp.allclose(out4, ref4, atol=1e-5, rtol=1e-5)

    print("KERNEL_OK")
</pallas_src>

<mosaic_0001>
module attributes {stable_mosaic.version = 11 : i64} {
  func.func @_fc_block_kernel(%arg0: i32, %arg1: i32, %arg2: i32, %arg3: memref<8x128xf32, #tpu.memory_space<vmem>>, %arg4: memref<128x256xf32, #tpu.memory_space<vmem>>, %arg5: memref<1x256xf32, #tpu.memory_space<vmem>>, %arg6: memref<8x256xf32, #tpu.memory_space<vmem>>) attributes {dimension_semantics = [#tpu.dimension_semantics<parallel>, #tpu.dimension_semantics<parallel>, #tpu.dimension_semantics<arbitrary>], iteration_bounds = array<i64: 1, 1, 1>, scalar_prefetch = 0 : i64, scratch_operands = 0 : i64, tpu.core_type = #tpu.core_type<tc>, window_params = [{transform_indices = @transform_0, window_bounds = array<i64: 8, 128>}, {transform_indices = @transform_1, window_bounds = array<i64: 128, 256>}, {transform_indices = @transform_2, window_bounds = array<i64: 1, 256>}, {transform_indices = @transform_3, window_bounds = array<i64: 8, 256>}]} {
    %c0_i32 = arith.constant 0 : i32
    %0 = arith.cmpi eq, %arg2, %c0_i32 : i32
    %1 = arith.extui %0 : i1 to i32
    %c0_i32_0 = arith.constant 0 : i32
    %2 = arith.cmpi ne, %1, %c0_i32_0 : i32
    scf.if %2 {
      %cst_10 = arith.constant 0.000000e+00 : f32
      %12 = vector.broadcast %cst_10 : f32 to vector<8x256xf32>
      %c0_11 = arith.constant 0 : index
      %c0_12 = arith.constant 0 : index
      %13 = vector.load %arg6[%c0_11, %c0_12] : memref<8x256xf32, #tpu.memory_space<vmem>>, vector<8x256xf32>
      tpu.vector_store %arg6[%c0_11, %c0_12], %12 {strides = array<i32>} : memref<8x256xf32, #tpu.memory_space<vmem>>, vector<8x256xf32>,
    } else {
    }
    %c0 = arith.constant 0 : index
    %c0_1 = arith.constant 0 : index
    %3 = vector.load %arg6[%c0, %c0_1] : memref<8x256xf32, #tpu.memory_space<vmem>>, vector<8x256xf32>
    %c0_2 = arith.constant 0 : index
    %c0_3 = arith.constant 0 : index
    %4 = vector.load %arg3[%c0_2, %c0_3] : memref<8x128xf32, #tpu.memory_space<vmem>>, vector<8x128xf32>
    %c0_4 = arith.constant 0 : index
    %c0_5 = arith.constant 0 : index
    %5 = vector.load %arg4[%c0_4, %c0_5] : memref<128x256xf32, #tpu.memory_space<vmem>>, vector<128x256xf32>
    %cst = arith.constant dense<0.000000e+00> : vector<8x256xf32>
    %6 = tpu.matmul %4, %5, %cst {dimension_numbers = #tpu.dot_dimension_numbers<[1], [0], [0], [1], [0, 0, 1, 1], [], []>} : vector<8x128xf32>, vector<128x256xf32>, vector<8x256xf32> -> vector<8x256xf32>
    %7 = arith.addf %3, %6 : vector<8x256xf32>
    %c0_6 = arith.constant 0 : index
    %c0_7 = arith.constant 0 : index
    %8 = vector.load %arg6[%c0_6, %c0_7] : memref<8x256xf32, #tpu.memory_space<vmem>>, vector<8x256xf32>
    tpu.vector_store %arg6[%c0_6, %c0_7], %7 {strides = array<i32>} : memref<8x256xf32, #tpu.memory_space<vmem>>, vector<8x256xf32>,
    %c0_i32_8 = arith.constant 0 : i32
    %9 = arith.cmpi eq, %arg2, %c0_i32_8 : i32
    %10 = arith.extui %9 : i1 to i32
    %c0_i32_9 = arith.constant 0 : i32
    %11 = arith.cmpi ne, %10, %c0_i32_9 : i32
    scf.if %11 {
      %c0_10 = arith.constant 0 : index
      %c0_11 = arith.constant 0 : index
      %12 = vector.load %arg6[%c0_10, %c0_11] : memref<8x256xf32, #tpu.memory_space<vmem>>, vector<8x256xf32>
      %c0_12 = arith.constant 0 : index
      %c0_13 = arith.constant 0 : index
      %13 = vector.load %arg5[%c0_12, %c0_13] : memref<1x256xf32, #tpu.memory_space<vmem>>, vector<1x256xf32>
      %14 = vector.broadcast %13 : vector<1x256xf32> to vector<8x256xf32>
      %15 = arith.addf %12, %14 : vector<8x256xf32>
      %cst_14 = arith.constant 0.000000e+00 : f32
      %16 = vector.broadcast %cst_14 : f32 to vector<8x256xf32>
      %17 = arith.maximumf %15, %16 : vector<8x256xf32>
      %c0_15 = arith.constant 0 : index
      %c0_16 = arith.constant 0 : index
      %18 = vector.load %arg6[%c0_15, %c0_16] : memref<8x256xf32, #tpu.memory_space<vmem>>, vector<8x256xf32>
      tpu.vector_store %arg6[%c0_15, %c0_16], %17 {strides = array<i32>} : memref<8x256xf32, #tpu.memory_space<vmem>>, vector<8x256xf32>,
    } else {
    }
    return
  }
  func.func @transform_0(%arg0: i32, %arg1: i32, %arg2: i32) -> (i32, i32) {
    %c0_i32 = arith.constant 0 : i32
    return %arg0, %arg2 : i32, i32
  }
  func.func @transform_1(%arg0: i32, %arg1: i32, %arg2: i32) -> (i32, i32) {
    %c0_i32 = arith.constant 0 : i32
    return %arg2, %arg1 : i32, i32
  }
  func.func @transform_2(%arg0: i32, %arg1: i32, %arg2: i32) -> (i32, i32) {
    %c0_i32 = arith.constant 0 : i32
    %c0_i32_0 = arith.constant 0 : i32
    return %c0_i32, %arg1 : i32, i32
  }
  func.func @transform_3(%arg0: i32, %arg1: i32, %arg2: i32) -> (i32, i32) {
    %c0_i32 = arith.constant 0 : i32
    return %arg0, %arg1 : i32, i32
  }
}

</mosaic_0001>

<bundles_post_ra>
// kernel: tpu_custom_call.1
= control target key start
LH: loop header
LB: loop body
LE: loop exit
PB: predicated region body
PF: predicated region fallthrough
CT: control target
= control target key end

     0   :  { %8 = vsyncpa [#allocation3], 0  ;;  %s378_s0 = inlined_call_operand.hbm [shape: f32[8,128], index: 0, kind: input, shape index: {}]   ;;  %s379_s1 = inlined_call_operand.hbm [shape: f32[128,256], index: 1, kind: input, shape index: {}]   ;;  %s380_s2 = inlined_call_operand.vmem [shape: f32[1,256], index: 2, kind: input, shape index: {}]   ;;  %s381_s3 = inlined_call_operand.hbm [shape: f32[8,256], index: 3, kind: output, shape index: {}]  }
   0x1   :  { %9 = vsyncpa [#allocation6], 0 }
   0x2   :  { %10 = vsyncpa [#allocation4], 0  ;;  %s306_s12 = smov [#allocation2]   ;;  %s307_s14 = smov [#allocation5]  }
   0x3   :  { %s17_s13 = sshll.u32 %s306_s12, 4  ;;  %s26_s15 = sshll.u32 %s307_s14, 4  ;;  %s18_s13 = int_to_ptr.vmem [resolvable:$true] %s17_s13  ;;  %s332_s15 = int_to_ptr.vmem [resolvable:$true] %s26_s15 }
   0x4   :  { %s234_s18 = scalar_lea.hbm %s378_s0, 128 }
   0x5   :  { %p235_p0 = scmp.ne.s32.totalorder %s378_s0, %s234_s18  ;;  %p238_p1 = scmp.lt.u32.totalorder %s234_s18, %s378_s0 }
   0x7   :  { %p240_p2 = pnand %p238_p1, %p235_p0 }
   0x9   :  { %243 = shalt.err (!%p240_p2)
}
   0xa   :  { %s244_s23 = scalar_lea.vmem %s18_s13, 128  ;;  %p249_p4 = scmp.lt.s32.totalorder %s18_s13, %s18_s13 }
   0xb   :  { %p245_p3 = scmp.ne.s32.totalorder %s18_s13, %s244_s23  ;;  %p250_p5 = scmp.lt.s32.totalorder %s244_s23, %s244_s23 }
   0xd   :  { %p251_p6 = por %p250_p5, %p249_p4 }
   0xf   :  { %p252_p7 = pnand %p251_p6, %p245_p3 }
  0x11   :  { %255 = shalt.err (!%p252_p7)
}
  0x12   :  { %20 = dma.hbm_to_vmem [thread:$0]  %s378_s0, 128, %s18_s13, [#allocation3]  }
  0x13   :  { %s256_s28 = scalar_lea.hbm %s379_s1, 4096 }
  0x14   :  { %p257_p8 = scmp.ne.s32.totalorder %s379_s1, %s256_s28  ;;  %p260_p9 = scmp.lt.u32.totalorder %s256_s28, %s379_s1 }
  0x16   :  { %p262_p10 = pnand %p260_p9, %p257_p8 }
  0x18   :  { %265 = shalt.err (!%p262_p10)
}
  0x19   :  { %s266_s6 = scalar_lea.vmem %s332_s15, 4096  ;;  %p271_p12 = scmp.lt.s32.totalorder %s332_s15, %s332_s15 }
  0x1a   :  { %p267_p11 = scmp.ne.s32.totalorder %s332_s15, %s266_s6  ;;  %p272_p13 = scmp.lt.s32.totalorder %s266_s6, %s266_s6 }
  0x1c   :  { %p273_p0 = por %p272_p13, %p271_p12 }
  0x1e   :  { %p274_p1 = pnand %p273_p0, %p267_p11 }
  0x20   :  { %277 = shalt.err (!%p274_p1)
}
  0x21   :  { %s308_s0 = smov 256   ;;  %s309_s7 = smov 16  }
  0x22   :  { %32 = dma.hbm_to_vmem [thread:$0]  %s379_s1, 4096, %s332_s15, [#allocation6], %s308_s0, %s308_s0, %s309_s7  }
  0x23   :  { %300 = dma.done.wait [#allocation3], 128  }
  0x24   :  { %301 = vsyncadd [#allocation3], 4294967168 }
  0x25   :  { %302 = dma.done.wait [#allocation6], 4096  }
  0x26   :  { %303 = vsyncadd [#allocation6], 4294963200  ;;  %v310_v0 = vmov 0.0   ;;  %v51_v1 = vld [vmem:[#allocation5 + $0x8] sm:$0xff]  ;;  %v53_v2 = vld [vmem:[#allocation5 + $0x18] sm:$0xff]  ;;  %v164_v50 = vlaneseq  ;;  %s311_s11 = smov [#allocation7]  }
  0x27   :  { %146 = vmatprep.mubr.f32.mxu0 %v310_v0  ;;  %v50_v3 = vld [vmem:[#allocation5] sm:$0xff]  ;;  %v196_v4 = vpack.c.bf16 %v53_v2, %v51_v1  ;;  %v52_v5 = vld [vmem:[#allocation5 + $0x10] sm:$0xff]  ;;  %v55_v6 = vld [vmem:[#allocation5 + $0x28] sm:$0xff]  ;;  %s186_s12 = sshll.u32 %s311_s11, 4  ;;  %s187_s12 = int_to_ptr.vmem [resolvable:$true] %s186_s12 }
  0x28   :  { %v57_v7 = vld [vmem:[#allocation5 + $0x38] sm:$0xff]  ;;  %v198_v8 = vpack.c.bf16 %v52_v5, %v50_v3  ;;  %v54_v10 = vld [vmem:[#allocation5 + $0x20] sm:$0xff]  ;;  %v56_v11 = vld [vmem:[#allocation5 + $0x30] sm:$0xff]  ;;  %v165_v51 = vshrl.u32 %v164_v50, 7  ;;  %s278_s13 = scalar_lea.vmem %s187_s12, 256  ;;  %p283_p3 = scmp.lt.s32.totalorder %s187_s12, %s187_s12 }
  0x29   :  { %v200_v9 = vpack.c.bf16 %v57_v7, %v55_v6  ;;  %v59_v12 = vld [vmem:[#allocation5 + $0x48] sm:$0xff]  ;;  %197 = vmatprep.subr.bf16.mxu0 %v196_v4  ;;  %v61_v13 = vld [vmem:[#allocation5 + $0x58] sm:$0xff]  ;;  %v202_v14 = vpack.c.bf16 %v56_v11, %v54_v10  ;;  %v58_v16 = vld [vmem:[#allocation5 + $0x40] sm:$0xff]  ;;  %p279_p2 = scmp.ne.s32.totalorder %s187_s12, %s278_s13  ;;  %p284_p4 = scmp.lt.s32.totalorder %s278_s13, %s278_s13 }
  0x2a   :  { %199 = vmatpush1.bf16.msra.mxu0 %v198_v8  ;;  %v204_v15 = vpack.c.bf16 %v61_v13, %v59_v12  ;;  %v60_v17 = vld [vmem:[#allocation5 + $0x50] sm:$0xff]  ;;  %v63_v18 = vld [vmem:[#allocation5 + $0x68] sm:$0xff]  ;;  %v65_v19 = vld [vmem:[#allocation5 + $0x78] sm:$0xff]  ;;  %v166_v52 = vsub.s32 0, %v165_v51  ;;  %v170_v54 = vsub.s32 1, %v165_v51 }
  0x2b   :  { %201 = vmatprep.subr.bf16.mxu0 %v200_v9  ;;  %v206_v20 = vpack.c.bf16 %v60_v17, %v58_v16  ;;  %v208_v21 = vpack.c.bf16 %v65_v19, %v63_v18  ;;  %v62_v22 = vld [vmem:[#allocation5 + $0x60] sm:$0xff]  ;;  %v64_v23 = vld [vmem:[#allocation5 + $0x70] sm:$0xff]  ;;  %v67_v24 = vld [vmem:[#allocation5 + $0x88] sm:$0xff]  ;;  %p285_p5 = por %p284_p4, %p283_p3 }
  0x2c   :  { %v69_v25 = vld [vmem:[#allocation5 + $0x98] sm:$0xff]  ;;  %v210_v26 = vpack.c.bf16 %v64_v23, %v62_v22  ;;  %v66_v28 = vld [vmem:[#allocation5 + $0x80] sm:$0xff]  ;;  %v68_v29 = vld [vmem:[#allocation5 + $0x90] sm:$0xff] }
  0x2d   :  { %v212_v27 = vpack.c.bf16 %v69_v25, %v67_v24  ;;  %v71_v30 = vld [vmem:[#allocation5 + $0xa8] sm:$0xff]  ;;  %v73_v31 = vld [vmem:[#allocation5 + $0xb8] sm:$0xff]  ;;  %v214_v32 = vpack.c.bf16 %v68_v29, %v66_v28  ;;  %v70_v34 = vld [vmem:[#allocation5 + $0xa0] sm:$0xff]  ;;  %p286_p6 = pnand %p285_p5, %p279_p2 }
  0x2e   :  { %203 = vmatpush1.bf16.msra.mxu0 %v202_v14  ;;  %v216_v33 = vpack.c.bf16 %v73_v31, %v71_v30  ;;  %v72_v35 = vld [vmem:[#allocation5 + $0xb0] sm:$0xff]  ;;  %v75_v36 = vld [vmem:[#allocation5 + $0xc8] sm:$0xff]  ;;  %v77_v37 = vld [vmem:[#allocation5 + $0xd8] sm:$0xff] }
  0x2f   :  { %205 = vmatprep.subr.bf16.mxu0 %v204_v15  ;;  %v218_v38 = vpack.c.bf16 %v72_v35, %v70_v34  ;;  %v220_v39 = vpack.c.bf16 %v77_v37, %v75_v36  ;;  %v74_v40 = vld [vmem:[#allocation5 + $0xc0] sm:$0xff]  ;;  %v76_v41 = vld [vmem:[#allocation5 + $0xd0] sm:$0xff]  ;;  %v79_v42 = vld [vmem:[#allocation5 + $0xe8] sm:$0xff] }
  0x30   :  { %v81_v43 = vld [vmem:[#allocation5 + $0xf8] sm:$0xff]  ;;  %v222_v44 = vpack.c.bf16 %v76_v41, %v74_v40  ;;  %v78_v46 = vld [vmem:[#allocation5 + $0xe0] sm:$0xff]  ;;  %v80_v47 = vld [vmem:[#allocation5 + $0xf0] sm:$0xff] }
  0x31   :  { %v224_v45 = vpack.c.bf16 %v81_v43, %v79_v42  ;;  %v226_v48 = vpack.c.bf16 %v80_v47, %v78_v46  ;;  %v49_v49 = vld [vmem:[#allocation2] sm:$0xff] }
  0x32   :  { %207 = vmatpush1.bf16.msra.mxu0 %v206_v20  ;;  %v162_v53 = vld [vmem:[%s380_s2] sm:$0x3] }
  0x33   :  { %209 = vmatprep.subr.bf16.mxu0 %v208_v21  ;;  %v167_v55 = vrot.slane %v162_v53, %v166_v52  ;;  %v171_v57 = vrot.slane %v162_v53, %v170_v54 }
  0x36   :  { %211 = vmatpush1.bf16.msra.mxu0 %v210_v26 }
  0x37   :  { %213 = vmatprep.subr.bf16.mxu0 %v212_v27 }
  0x3a   :  { %215 = vmatpush1.bf16.msra.mxu0 %v214_v32 }
  0x3b   :  { %217 = vmatprep.subr.bf16.mxu0 %v216_v33 }
  0x3e   :  { %219 = vmatpush1.bf16.msra.mxu0 %v218_v38 }
  0x3f   :  { %221 = vmatprep.subr.bf16.mxu0 %v220_v39 }
  0x42   :  { %223 = vmatpush1.bf16.msra.mxu0 %v222_v44 }
  0x43   :  { %225 = vmatprep.subr.bf16.mxu0 %v224_v45 }
  0x46   :  { %227 = vmatpush1.bf16.msra.mxu0 %v226_v48 }
  0x49   :  { %147 = vmatmul.mubr.f32.vlgmr.msra.gmra.mrb[0].mxu0 %v49_v49 }
 0x11c   :  { %v148_v56 = vpop.f32.mrb[0].mxu0 }
 0x11d   :  { %v150_v58 = vpop.f32.mrb[1].mxu0  ;;  %v174_v59 = vadd.f32 %v167_v55, %v148_v56 }
 0x11e   :  { %v175_v60 = vadd.f32 %v171_v57, %v150_v58 }
 0x11f   :  { %v176_v61 = vmax.f32 %v174_v59, 0.0 }
 0x120   :  { %v177_v62 = vmax.f32 %v175_v60, 0.0 }
 0x121   :  { %178 = vst [vmem:[#allocation7] sm:$0xff] %v176_v61 }
 0x122   :  { %179 = vst [vmem:[#allocation7 + $0x8] sm:$0xff] %v177_v62 }
 0x123   :  { %289 = shalt.err (!%p286_p6)
}
 0x124   :  { %s290_s15 = scalar_lea.hbm %s381_s3, 256 }
 0x125   :  { %p291_p7 = scmp.ne.s32.totalorder %s381_s3, %s290_s15  ;;  %p294_p8 = scmp.lt.u32.totalorder %s290_s15, %s381_s3 }
 0x127   :  { %p296_p9 = pnand %p294_p8, %p291_p7 }
 0x129   :  { %299 = shalt.err (!%p296_p9)
}
 0x12a   :  { %189 = dma.vmem_to_hbm [thread:$0]  %s187_s12, 256, %s381_s3, [#allocation4]  }
 0x12b   :  { %304 = dma.done.wait [#allocation4], 256  }
 0x12c   :  { %305 = vsyncadd [#allocation4], 4294967040 }
 0x12d   :  { %193 = vsyncpa [#allocation3], 1 }
 0x12e   :  { %194 = vsyncpa [#allocation6], 1 }
 0x12f   :  { %195 = vsyncpa [#allocation4], 1 }

</bundles_post_ra>
